<compile_context>
chip_gen: v7x
topology: tpu7x:2x2x1
jax: 0.10.0
libtpu: 0.0.40
codegen_flags: <defaults>
</compile_context>

<pallas_src>
import jax
import jax.numpy as jnp
from jax import lax
from jax.experimental import pallas as pl
from jax.experimental.pallas import tpu as pltpu


# ---------------------------------------------------------------------------
# Kernel 1: fused q/k/v projection (1x1 conv == channel matmul) per query tile.
# The value output carries an extra constant ones row so the attention kernel
# gets the softmax row-sums straight out of the MXU.
# ---------------------------------------------------------------------------
def _qkv_projection_kernel(x_ref,                 # VMEM (1, C, TQ)   f32
                           w_ref,                 # VMEM (2K+C+1, C)  bf16 (q|k|v|0-row)
                           b_ref,                 # VMEM (2K+C+1, 1)  f32  (bq|bk|bv|1)
                           q_ref,                 # VMEM (1, K, TQ)   bf16
                           k_ref,                 # VMEM (1, K, TQ)   bf16
                           v_ref):                # VMEM (1, C+1, TQ) bf16
    kc = q_ref.shape[1]
    x = x_ref[0].astype(jnp.bfloat16)                                    # (C, TQ)
    proj = jnp.dot(w_ref[...], x,
                   preferred_element_type=jnp.float32) + b_ref[...]     # (2K+C+1, TQ) f32
    q_ref[0] = proj[:kc].astype(jnp.bfloat16)
    k_ref[0] = proj[kc:2 * kc].astype(jnp.bfloat16)
    v_ref[0] = proj[2 * kc:].astype(jnp.bfloat16)                        # last row == 1.0


# ---------------------------------------------------------------------------
# Kernel 2: attention for one tile of TQ query columns of one batch element.
# k / v_aug use a (b, 0, 0) full-N BlockSpec, so they are DMA'd once per batch
# element and reused across all query tiles.
# ---------------------------------------------------------------------------
def _attention_kernel(gamma_ref,                  # SMEM (1,)
                      q_ref,                      # VMEM (1, K, TQ)   bf16
                      k_ref,                      # VMEM (1, K, N)    bf16
                      v_ref,                      # VMEM (1, C+1, N)  bf16 (ones row last)
                      x_ref,                      # VMEM (1, C, TQ)   f32 (residual)
                      o_ref):                     # VMEM (1, C, TQ)   f32
    c = o_ref.shape[1]
    q = q_ref[0]                                  # (K, TQ)
    k = k_ref[0]                                  # (K, N)
    v = v_ref[0]                                  # (C+1, N)

    # scores[n, m] = sum_k q[k, n] * key[k, m]  (bf16 MXU operands, f32 accumulation).
    scores = lax.dot_general(q, k, (((0,), (0,)), ((), ())),
                             preferred_element_type=jnp.float32)         # (TQ, N)

    # Unnormalized softmax; cast straight to bf16 so only one f32 (TQ,N) temp plus
    # one bf16 copy are live.  The denominator comes from the ones row of v below.
    m = jnp.max(scores, axis=-1, keepdims=True)
    e = jnp.exp(scores - m).astype(jnp.bfloat16)                          # (TQ, N)

    # out_aug[c, n] = sum_m v_aug[c, m] * e[n, m]:
    #   rows [:C]  -> unnormalized output, row [C] -> softmax row-sums (>= 1).
    out_aug = lax.dot_general(v, e, (((1,), (1,)), ((), ())),
                              preferred_element_type=jnp.float32)         # (C+1, TQ)
    out = out_aug[:c] * pl.reciprocal(out_aug[c:c + 1], approx=True)      # (C, TQ)

    o_ref[0] = gamma_ref[0] * out + x_ref[0]


# ---------------------------------------------------------------------------
# Generation-aware tiling.
# ---------------------------------------------------------------------------
def _vmem_capacity_bytes() -> int:
    """Physical VMEM per TensorCore; conservative (v7x) fallback if unknown."""
    try:
        cap = getattr(pltpu.get_tpu_info(), "vmem_capacity_bytes", None)
        if cap:
            return int(cap)
    except Exception:
        pass
    return 64 * 1024 * 1024


def _attention_live_bytes(n: int, kc: int, c: int, tq: int) -> int:
    """Honest per-grid-step VMEM accounting for the attention kernel."""
    resident = 2 * ((kc + c + 1) * n * 2)              # k + v_aug bf16, double-buffered
    streamed = 2 * (kc * tq * 2 + 2 * c * tq * 4)      # q tile bf16, x tile + out tile f32
    temps = tq * n * (4 + 4 + 2) + (c + 1) * tq * 4    # scores f32, exp f32, exp bf16, out_aug
    return resident + streamed + temps


def _pick_query_tile(n: int, kc: int, c: int, budget: int) -> int:
    if n % 128 != 0:
        # Lane-dim blocks must be a multiple of 128 or the full dim; no tiling possible.
        return n
    best = 128
    tq = 128
    while tq <= min(n, 4096):
        if n % tq == 0 and _attention_live_bytes(n, kc, c, tq) <= budget:
            best = tq
        tq *= 2
    return best


# ---------------------------------------------------------------------------
# Wrapper.
# ---------------------------------------------------------------------------
def self_attention_block(x_nchw, wq, bq, wk, bk, wv, bv, gamma):
    """x_nchw: (B, C, H, W) f32.  Torch Conv2d 1x1 convention: wq/wk: (K, C),
       wv: (C, C), biases (K,), (K,), (C,), gamma: (1,)."""
    B, C, H, W = x_nchw.shape
    K = wq.shape[0]
    N = H * W
    R = 2 * K + C + 1

    x_bcn = x_nchw.reshape(B, C, N)                     # free reshape (NCHW -> (B, C, N))

    # Fused projection weights (q | k | v | zeros-row), bf16 once; bias (.. | 1) stays f32.
    w_all = jnp.concatenate([wq, wk, wv, jnp.zeros((1, C), wv.dtype)],
                            axis=0).astype(jnp.bfloat16)                   # (R, C)
    b_all = jnp.concatenate([bq, bk, bv, jnp.ones((1,), bv.dtype)],
                            axis=0).reshape(R, 1)                          # (R, 1)

    vmem_cap = _vmem_capacity_bytes()
    vmem_limit = int(min((vmem_cap * 3) // 4, 100 * 1024 * 1024))          # 48 MiB v7x, 96 MiB v5e/v6e
    tq = _pick_query_tile(N, K, C, budget=(vmem_limit * 17) // 20)
    n_q = N // tq
    grid = (B, n_q)
    cparams = pltpu.CompilerParams(dimension_semantics=("parallel", "parallel"),
                                   vmem_limit_bytes=vmem_limit)

    # --- projection pass: q/k/v (+ ones row) in bf16, computed exactly once ---------
    q_bf, k_bf, v_bf = pl.pallas_call(
        _qkv_projection_kernel,
        out_shape=(jax.ShapeDtypeStruct((B, K, N), jnp.bfloat16),
                   jax.ShapeDtypeStruct((B, K, N), jnp.bfloat16),
                   jax.ShapeDtypeStruct((B, C + 1, N), jnp.bfloat16)),
        grid=grid,
        in_specs=[
            pl.BlockSpec((1, C, tq), lambda b, qi: (b, 0, qi)),            # x tile
            pl.BlockSpec((R, C), lambda b, qi: (0, 0)),                    # fused weights
            pl.BlockSpec((R, 1), lambda b, qi: (0, 0)),                    # fused bias
        ],
        out_specs=[
            pl.BlockSpec((1, K, tq), lambda b, qi: (b, 0, qi)),
            pl.BlockSpec((1, K, tq), lambda b, qi: (b, 0, qi)),
            pl.BlockSpec((1, C + 1, tq), lambda b, qi: (b, 0, qi)),
        ],
        compiler_params=cparams,
        cost_estimate=pl.CostEstimate(
            flops=int(B * 2 * R * C * N),
            transcendentals=0,
            bytes_accessed=int(B * (C * N * 4 + R * N * 2) + R * (C * 2 + 4))),
    )(x_bcn, w_all, b_all)

    # --- attention pass --------------------------------------------------------------
    out_bcn = pl.pallas_call(
        _attention_kernel,
        out_shape=jax.ShapeDtypeStruct((B, C, N), jnp.float32),
        grid=grid,
        in_specs=[
            pl.BlockSpec(memory_space=pltpu.MemorySpace.SMEM),             # gamma (1,)
            pl.BlockSpec((1, K, tq), lambda b, qi: (b, 0, qi)),            # q tile (bf16)
            pl.BlockSpec((1, K, N), lambda b, qi: (b, 0, 0)),              # k, full N (bf16)
            pl.BlockSpec((1, C + 1, N), lambda b, qi: (b, 0, 0)),          # v_aug, full N (bf16)
            pl.BlockSpec((1, C, tq), lambda b, qi: (b, 0, qi)),            # x residual tile (f32)
        ],
        out_specs=pl.BlockSpec((1, C, tq), lambda b, qi: (b, 0, qi)),
        compiler_params=cparams,
        cost_estimate=pl.CostEstimate(
            flops=int(B * 2 * N * N * (K + C + 1)),
            transcendentals=int(B * N * N),
            bytes_accessed=int(B * (2 * K * N * 2 + (C + 1) * N * 2 + 2 * C * N * 4))),
    )(gamma, q_bf, k_bf, v_bf, x_bcn)

    return out_bcn.reshape(B, C, H, W)


# ---------------------------------------------------------------------------
# Plain-JAX (f32) reference mirroring the PyTorch forward exactly.
# ---------------------------------------------------------------------------
def _reference(x_nchw, wq, bq, wk, bk, wv, bv, gamma):
    B, C, H, W = x_nchw.shape
    N = H * W
    x_flat = x_nchw.reshape(B, C, N)
    q = jnp.einsum('oc,bcn->bon', wq, x_flat) + bq[None, :, None]
    k = jnp.einsum('oc,bcn->bon', wk, x_flat) + bk[None, :, None]
    v = jnp.einsum('oc,bcn->bon', wv, x_flat) + bv[None, :, None]
    query = jnp.transpose(q, (0, 2, 1))
    scores = jnp.einsum('bnk,bkm->bnm', query, k)
    attn = jax.nn.softmax(scores, axis=-1)
    out = jnp.einsum('bcm,bnm->bcn', v, attn).reshape(B, C, H, W)
    return gamma[0] * out + x_nchw


if __name__ == "__main__":
    B, C, H, W = 2, 4, 16, 16
    key_channels = 32

    key = jax.random.PRNGKey(0)
    kx, kwq, kbq, kwk, kbk, kwv, kbv = jax.random.split(key, 7)

    x = jax.random.normal(kx, (B, C, H, W), dtype=jnp.float32)
    wq = jax.random.normal(kwq, (key_channels, C), dtype=jnp.float32) * 0.1
    bq = jax.random.normal(kbq, (key_channels,), dtype=jnp.float32) * 0.1
    wk = jax.random.normal(kwk, (key_channels, C), dtype=jnp.float32) * 0.1
    bk = jax.random.normal(kbk, (key_channels,), dtype=jnp.float32) * 0.1
    wv = jax.random.normal(kwv, (C, C), dtype=jnp.float32) * 0.1
    bv = jax.random.normal(kbv, (C,), dtype=jnp.float32) * 0.1
    # nn.Parameter(torch.zeros(1)) would make the block a pass-through; use a
    # deterministic nonzero gamma so the attention path is actually exercised.
    gamma = jnp.array([0.5], dtype=jnp.float32)

    out = self_attention_block(x, wq, bq, wk, bk, wv, bv, gamma)
    out = jax.block_until_ready(out)

    ref = _reference(x, wq, bq, wk, bk, wv, bv, gamma)
    assert out.shape == (B, C, H, W)
    # Tolerance accounts for bf16 MXU operands end-to-end (projections, scores, attn)
    # plus the approx EUP reciprocal; softmax exp/accumulation stays f32.
    assert jnp.allclose(out, ref, atol=1e-2, rtol=1e-2), "mismatch vs reference"

    print("KERNEL_OK")
</pallas_src>

<mosaic_0001>
module attributes {stable_mosaic.version = 11 : i64} {
  func.func @_qkv_projection_kernel(%arg0: i32, %arg1: i32, %arg2: memref<1x4x256xf32, #tpu.memory_space<vmem>>, %arg3: memref<69x4xbf16, #tpu.memory_space<vmem>>, %arg4: memref<69x1xf32, #tpu.memory_space<vmem>>, %arg5: memref<1x32x256xbf16, #tpu.memory_space<vmem>>, %arg6: memref<1x32x256xbf16, #tpu.memory_space<vmem>>, %arg7: memref<1x5x256xbf16, #tpu.memory_space<vmem>>) attributes {dimension_semantics = [#tpu.dimension_semantics<parallel>, #tpu.dimension_semantics<parallel>], iteration_bounds = array<i64: 2, 1>, scalar_prefetch = 0 : i64, scratch_operands = 0 : i64, tpu.core_type = #tpu.core_type<tc>, window_params = [{transform_indices = @transform_0, window_bounds = array<i64: 1, 4, 256>}, {pipeline_mode = #tpu.pipeline_mode<synchronous>, transform_indices = @transform_1, window_bounds = array<i64: 69, 4>}, {pipeline_mode = #tpu.pipeline_mode<synchronous>, transform_indices = @transform_2, window_bounds = array<i64: 69, 1>}, {transform_indices = @transform_3, window_bounds = array<i64: 1, 32, 256>}, {transform_indices = @transform_4, window_bounds = array<i64: 1, 32, 256>}, {transform_indices = @transform_5, window_bounds = array<i64: 1, 5, 256>}]} {
    %c0 = arith.constant 0 : index
    %c0_0 = arith.constant 0 : index
    %c0_1 = arith.constant 0 : index
    %0 = vector.load %arg2[%c0, %c0_0, %c0_1] : memref<1x4x256xf32, #tpu.memory_space<vmem>>, vector<1x4x256xf32>
    %1 = vector.shape_cast %0 : vector<1x4x256xf32> to vector<4x256xf32>
    %2 = arith.truncf %1 : vector<4x256xf32> to vector<4x256xbf16>
    %c0_2 = arith.constant 0 : index
    %c0_3 = arith.constant 0 : index
    %3 = vector.load %arg3[%c0_2, %c0_3] : memref<69x4xbf16, #tpu.memory_space<vmem>>, vector<69x4xbf16>
    %cst = arith.constant dense<0.000000e+00> : vector<69x256xf32>
    %4 = tpu.matmul %3, %2, %cst {dimension_numbers = #tpu.dot_dimension_numbers<[1], [0], [0], [1], [0, 0, 1, 1], [], []>} : vector<69x4xbf16>, vector<4x256xbf16>, vector<69x256xf32> -> vector<69x256xf32>
    %c0_4 = arith.constant 0 : index
    %c0_5 = arith.constant 0 : index
    %5 = vector.load %arg4[%c0_4, %c0_5] : memref<69x1xf32, #tpu.memory_space<vmem>>, vector<69x1xf32>
    %6 = vector.broadcast %5 : vector<69x1xf32> to vector<69x256xf32>
    %7 = arith.addf %4, %6 : vector<69x256xf32>
    %8 = vector.extract_strided_slice %7 {offsets = [0, 0], sizes = [32, 256], strides = [1, 1]} : vector<69x256xf32> to vector<32x256xf32>
    %9 = arith.truncf %8 : vector<32x256xf32> to vector<32x256xbf16>
    %c0_6 = arith.constant 0 : index
    %c0_7 = arith.constant 0 : index
    %c0_8 = arith.constant 0 : index
    %10 = vector.load %arg5[%c0_6, %c0_7, %c0_8] : memref<1x32x256xbf16, #tpu.memory_space<vmem>>, vector<1x32x256xbf16>
    %11 = vector.shape_cast %10 : vector<1x32x256xbf16> to vector<32x256xbf16>
    %12 = vector.shape_cast %9 : vector<32x256xbf16> to vector<1x32x256xbf16>
    tpu.vector_store %arg5[%c0_6, %c0_7, %c0_8], %12 {strides = array<i32>} : memref<1x32x256xbf16, #tpu.memory_space<vmem>>, vector<1x32x256xbf16>,
    %13 = vector.extract_strided_slice %7 {offsets = [32, 0], sizes = [32, 256], strides = [1, 1]} : vector<69x256xf32> to vector<32x256xf32>
    %14 = arith.truncf %13 : vector<32x256xf32> to vector<32x256xbf16>
    %c0_9 = arith.constant 0 : index
    %c0_10 = arith.constant 0 : index
    %c0_11 = arith.constant 0 : index
    %15 = vector.load %arg6[%c0_9, %c0_10, %c0_11] : memref<1x32x256xbf16, #tpu.memory_space<vmem>>, vector<1x32x256xbf16>
    %16 = vector.shape_cast %15 : vector<1x32x256xbf16> to vector<32x256xbf16>
    %17 = vector.shape_cast %14 : vector<32x256xbf16> to vector<1x32x256xbf16>
    tpu.vector_store %arg6[%c0_9, %c0_10, %c0_11], %17 {strides = array<i32>} : memref<1x32x256xbf16, #tpu.memory_space<vmem>>, vector<1x32x256xbf16>,
    %18 = vector.extract_strided_slice %7 {offsets = [64, 0], sizes = [5, 256], strides = [1, 1]} : vector<69x256xf32> to vector<5x256xf32>
    %19 = arith.truncf %18 : vector<5x256xf32> to vector<5x256xbf16>
    %c0_12 = arith.constant 0 : index
    %c0_13 = arith.constant 0 : index
    %c0_14 = arith.constant 0 : index
    %20 = vector.load %arg7[%c0_12, %c0_13, %c0_14] : memref<1x5x256xbf16, #tpu.memory_space<vmem>>, vector<1x5x256xbf16>
    %21 = vector.shape_cast %20 : vector<1x5x256xbf16> to vector<5x256xbf16>
    %22 = vector.shape_cast %19 : vector<5x256xbf16> to vector<1x5x256xbf16>
    tpu.vector_store %arg7[%c0_12, %c0_13, %c0_14], %22 {strides = array<i32>} : memref<1x5x256xbf16, #tpu.memory_space<vmem>>, vector<1x5x256xbf16>,
    return
  }
  func.func @transform_0(%arg0: i32, %arg1: i32) -> (i32, i32, i32) {
    %c0_i32 = arith.constant 0 : i32
    %c0_i32_0 = arith.constant 0 : i32
    return %arg0, %c0_i32, %arg1 : i32, i32, i32
  }
  func.func @transform_1(%arg0: i32, %arg1: i32) -> (i32, i32) {
    %c0_i32 = arith.constant 0 : i32
    %c0_i32_0 = arith.constant 0 : i32
    %c0_i32_1 = arith.constant 0 : i32
    return %c0_i32, %c0_i32_0 : i32, i32
  }
  func.func @transform_2(%arg0: i32, %arg1: i32) -> (i32, i32) {
    %c0_i32 = arith.constant 0 : i32
    %c0_i32_0 = arith.constant 0 : i32
    %c0_i32_1 = arith.constant 0 : i32
    return %c0_i32, %c0_i32_0 : i32, i32
  }
  func.func @transform_3(%arg0: i32, %arg1: i32) -> (i32, i32, i32) {
    %c0_i32 = arith.constant 0 : i32
    %c0_i32_0 = arith.constant 0 : i32
    return %arg0, %c0_i32, %arg1 : i32, i32, i32
  }
  func.func @transform_4(%arg0: i32, %arg1: i32) -> (i32, i32, i32) {
    %c0_i32 = arith.constant 0 : i32
    %c0_i32_0 = arith.constant 0 : i32
    return %arg0, %c0_i32, %arg1 : i32, i32, i32
  }
  func.func @transform_5(%arg0: i32, %arg1: i32) -> (i32, i32, i32) {
    %c0_i32 = arith.constant 0 : i32
    %c0_i32_0 = arith.constant 0 : i32
    return %arg0, %c0_i32, %arg1 : i32, i32, i32
  }
}

</mosaic_0001>

<bundles_post_ra>
// kernel: tpu_custom_call.1
= control target key start
LH: loop header
LB: loop body
LE: loop exit
PB: predicated region body
PF: predicated region fallthrough
CT: control target
= control target key end

     0   :  { %11 = vsyncpa [#allocation3], 0  ;;  %s1289_s0 = inlined_call_operand.vmem [shape: f32[2,4,256], index: 0, kind: input, shape index: {}]   ;;  %s1290_s1 = inlined_call_operand.vmem [shape: bf16[69,4], index: 1, kind: input, shape index: {}]   ;;  %s1291_s2 = inlined_call_operand.vmem [shape: f32[69,1], index: 2, kind: input, shape index: {}]   ;;  %s1292_s3 = inlined_call_operand.hbm [shape: bf16[2,32,256], index: 3, kind: output, shape index: {0}]   ;;  %s1293_s4 = inlined_call_operand.hbm [shape: bf16[2,32,256], index: 4, kind: output, shape index: {1}]   ;;  %s1294_s5 = inlined_call_operand.vmem [shape: bf16[2,5,256], index: 5, kind: output, shape index: {2}]  }
   0x1   :  { %13 = vsyncpa [#allocation3 + $0x1], 0 }
   0x2   :  { %14 = vsyncpa [#allocation5], 0 }
   0x3   :  { %16 = vsyncpa [#allocation5 + $0x1], 0  ;;  %s1037_s18 = smov 0   ;;  %s1039_s19 = smov 0  }
   0x4   :  { %s1041_s20 = smov 0   ;;  %s1043_s21 = smov 0  }
   0x5   :  { %s1045_s22 = smov 0   ;;  %s1047_s23 = smov 0  }
   0x6 LB: > { %s765_s24 = sadd.s32 4294967295, %s1000_s23   ;;  %s766_s25 = sadd.s32 4294967294, %s1000_s23   ;;  %s1000_s23 = sphi %s1047_s23, %s22_s23   ;;  %s996_s22 = sphi %s1045_s22, %s1305_s22   ;;  %s992_s21 = sphi %s1043_s21, %s1304_s21   ;;  %s988_s20 = sphi %s1041_s20, %s1303_s20   ;;  %s984_s19 = sphi %s1039_s19, %s1302_s19   ;;  %s980_s18 = sphi %s1037_s18, %s1301_s18  }
   0x7   : > { %s34_s26 = sadd.s32 1, %s996_s22  ;;  %s113_s27 = sadd.s32 1, %s988_s20 }
   0x8   : > { %p36_p0 = scmp.ge.s32.totalorder %s34_s26, 2  ;;  %p123_p1 = scmp.ne.s32.totalorder %s988_s20, %s984_s19 }
   0x9   : > { %p124_p2 = scmp.eq.s32.totalorder %s765_s24, 1  ;;  %p129_p3 = scmp.ne.s32.totalorder %s984_s19, %s980_s18 }
   0xa   : > { %s1307_s26 = smov (%p36_p0, %s34_s26), 0  ;;  %p130_p5 = scmp.eq.s32.totalorder %s766_s25, 1 }
   0xb   : > { %p1077_p4 = por %p124_p2, %p123_p1  ;;  %s108_s29 = ssub.s32 %s996_s22, %s1307_s26 }
   0xc   : > { %p769_p6 = scmp.ge.s32.totalorder %s1000_s23, 1  ;;  %p111_p7 = scmp.eq.s32.totalorder %s108_s29, 0 }
   0xd   : > { %p1084_p8 = por %p130_p5, %p129_p3  ;;  %p223_p9 = scmp.lt.s32.totalorder %s1000_s23, 3 }
   0xe   : > { %s1090_s6 = scalar_select %p111_p7, %s988_s20, %s113_s27  }
   0xf   : > { %p224_p10 = pnand %p769_p6, %p223_p9 }
  0x10   : > { %p270_p11 = scmp.lt.s32.totalorder (!%p224_p10), %s992_s21, 1  ;;  %v1002_v0 = vmov (!%p224_p10), 0   ;;  %v307_v1 = vld [vmem:[%s1291_s2] sm:$0xff] (!%p224_p10)  ;;  %vm400_vm0 = vcmask (!%p224_p10), 1041408   ;;  %v309_v3 = vld [vmem:[%s1291_s2 + $0x10] sm:$0xff] (!%p224_p10)  ;;  %v308_v6 = vld [vmem:[%s1291_s2 + $0x8] sm:$0xff] (!%p224_p10) }
  0x11   : > { %227 = sbr.rel (%p224_p10) target bundleno = 304 (0x130), region = 32  ;;  %439 = vmatprep.mubr.bf16.mxu0 (!%p224_p10), %v1002_v0  ;;  %469 = vmatprep.mubr.bf16.mxu1 (!%p224_p10), %v1002_v0  ;;  %v310_v9 = vld [vmem:[%s1291_s2 + $0x18] sm:$0xff] (!%p224_p10)  ;;  %v885_v10 = vld [vmem:[%s1290_s1] sm:$0xff] (!%p224_p10)   ;;  %vm384_vm1 = vcmask (!%p224_p10), 31744   ;;  %v312_v13 = vld [vmem:[%s1291_s2 + $0x28] sm:$0xff] (!%p224_p10)  ;;  %s1154_s14 = sand.u32 (!%p224_p10), 1, %s984_s19  }
  0x12   : > { %882 = vset.pattern.permute.xlu0 (!%p224_p10), %v1002_v0  ;;  %883 = vset.pattern.permute.xlu1 (!%p224_p10), %v1002_v0  ;;  %v886_v11 = vld [vmem:[%s1290_s1 + $0x18] sm:$0xff] (!%p224_p10)   ;;  %v311_v12 = vld [vmem:[%s1291_s2 + $0x20] sm:$0xff] (!%p224_p10)  ;;  %v313_v14 = vld [vmem:[%s1291_s2 + $0x30] sm:$0xff] (!%p224_p10)  ;;  %s770_s15 = sshll.u32 (!%p224_p10), %s1154_s14, 5  ;;  %vm552_vm2 = vcmask (!%p224_p10), 1042432   ;;  %vm555_vm4 = vcmask (!%p224_p10), 1046532  }
  0x13   : > { %318 = vperm.xlu0 (!%p224_p10), %882, %v307_v1   ;;  %328 = vperm.xlu1 (!%p224_p10), %883, %v309_v3   ;;  %v314_v15 = vld [vmem:[%s1291_s2 + $0x38] sm:$0xff] (!%p224_p10)  ;;  %v887_v16 = vld [vmem:[%s1290_s1 + $0x8] sm:$0xff] (!%p224_p10)   ;;  %v888_v17 = vld [vmem:[%s1290_s1 + $0x20] ss:$0 sps:$4 sm:$0x77] (!%p224_p10)   ;;  %s1157_s16 = scalar_lea.vmem (!%p224_p10), [#allocation2], %s770_s15 }
  0x14   : > { %v315_v18 = vld [vmem:[%s1291_s2 + $0x40] sm:$0x1f] (!%p224_p10)  ;;  %v889_v19 = vld [vmem:[%s1290_s1 + $0x10] sm:$0xff] (!%p224_p10)   ;;  %vm553_vm3 = vsmask.f32 (!%p224_p10), 2304  ;;  %s1160_s17 = scalar_lea.vmem (!%p224_p10), [#allocation4], %s770_s15 }
  0x15   : > { %vm556_vm5 = vsmask.f32 (!%p224_p10), 6400  ;;  %vm1164_vm6 = vmand (!%p224_p10), %vm552_vm2, %vm553_vm3  ;;  %s1003_s13 = smov (!%p224_p10), [#allocation2]  }
  0x16   : > { %vm1176_vm7 = vmand (!%p224_p10), %vm555_vm4, %vm556_vm5  ;;  %s894_s15 = sshll.u32 (!%p224_p10), %s1003_s13, 4  ;;  %s895_s15 = int_to_ptr.vmem [resolvable:$false] %s894_s15 }
  0x17   : > { %323 = vperm.xlu0 (!%p224_p10), %882, %v308_v6   ;;  %333 = vperm.xlu1 (!%p224_p10), %883, %v310_v9   ;;  %vm558_vm8 = vmor (!%p224_p10), %vm1176_vm7, %vm1164_vm6  ;;  %s896_s24 = scalar_lea.vmem (!%p224_p10), %s895_s15, 1024 }
  0x18   : > { %s1094_s7 = scalar_select %p270_p11, %s992_s21, 1 }
  0x1a   : > { %s804_s8 = sshll.u32 %s1094_s7, 3  ;;  %s592_s7 = sshll.u32 %s1157_s16, 4  ;;  %s1186_s7 = int_to_ptr.vmem [resolvable:$true] %s592_s7 }
  0x1b   : > { %s277_s11 = scalar_lea.vmem %s1289_s0, %s804_s8  ;;  %338 = vperm.xlu0 %882, %v311_v12   ;;  %343 = vperm.xlu1 %883, %v312_v13   ;;  %s289_s27 = scalar_lea.vmem %s1294_s5, %s804_s8 }
  0x1c   : > { %v292_v2 = vld [vmem:[%s277_s11] sm:$0xff]  ;;  %s815_s8 = sshll.u32 %s992_s21, 9  ;;  %s563_s11 = scalar_lea.sflag [#allocation3], %s1154_s14 }
  0x1d   : > { %v294_v4 = vcombine.high %v292_v2, %v292_v2  ;;  %v296_v5 = vpack.c.bf16 %v292_v2, %v292_v2  ;;  %v559_v61 = vld [vmem:[%s289_s27] sm:$0x77]  ;;  %s1193_s10 = scalar_lea.hbm %s1292_s3, %s815_s8  ;;  %s890_s12 = scalar_lea.vmem %s1186_s7, 512 }
  0x1e   : > { %p891_p12 = scmp.ne.s32.totalorder %s1186_s7, %s890_s12  ;;  %p897_p1 = scmp.lt.s32.totalorder %s1186_s7, %s895_s15 }
  0x1f   : > { %v297_v7 = vpack.c.bf16 %v294_v4, %v294_v4  ;;  %v402_v8 = vsel %vm400_vm0, %v296_v5, 0  ;;  %348 = vperm.xlu0 %882, %v313_v14   ;;  %353 = vperm.xlu1 %883, %v314_v15   ;;  %p898_p2 = scmp.lt.s32.totalorder %s896_s24, %s890_s12 }
  0x20   : > { %p892_p13 = pnand %p891_p12, %p1077_p4 }
  0x21   : > { %781 = vmatprep.subr.msk.bf16.mxu0 %vm400_vm0, %v297_v7  ;;  %817 = vmatprep.subr.msk.bf16.mxu1 %vm400_vm0, %v297_v7  ;;  %p899_p3 = por %p898_p2, %p897_p1 }
  0x22   : > { %408 = vmatpush1.bf16.msra.mxu0 %v402_v8  ;;  %818 = vmatpush1.bf16.msra.mxu1 %v402_v8  ;;  %p893_p0 = pneg %p892_p13 }
  0x23   : > { %358 = vperm.xlu0 %882, %v315_v18  }
  0x24   : > { %p900_p5 = pnand %p899_p3, %p893_p0 }
  0x25   : > { %782 = vmatmul.mubr.msk.bf16.vlgmr.msra.gmra.mrb[0].mxu0 %vm384_vm1, %v885_v10  ;;  %785 = vmatmul.mubr.msk.bf16.vlgmr.msra.gmra.mrb[0].mxu1 %vm384_vm1, %v886_v11 }
  0x26   : > { %449 = vmatprep.mubr.bf16.mxu0 %v1002_v0  ;;  %479 = vmatprep.mubr.bf16.mxu1 %v1002_v0 }
  0x2d   : > { %783 = vmatmul.mubr.msk.bf16.gmra.mrb[4].mxu0 %vm384_vm1, %v887_v16  ;;  %786 = vmatmul.mubr.msk.bf16.gmra.mrb[4].mxu1 %vm384_vm1, %v888_v17 }
  0x2e   : > { %459 = vmatprep.mubr.bf16.mxu0 %v1002_v0 }
  0x35   : > { %784 = vmatmul.mubr.msk.bf16.gmra.mrb[8].mxu0 %vm384_vm1, %v889_v19 }
  0x92   : > { %v319_v20 = vpop.permute.xlu0 %318  ;;  %v329_v21 = vpop.permute.xlu1 %328 }
  0x96   : > { %v324_v22 = vpop.permute.xlu0 %323  ;;  %v334_v23 = vpop.permute.xlu1 %333 }
  0x9a   : > { %v1149_v24 = vpop.permute.xlu0 %338  ;;  %v1151_v25 = vpop.permute.xlu1 %343 }
  0x9e   : > { %v349_v26 = vpop.permute.xlu0 %348  ;;  %v354_v27 = vpop.permute.xlu1 %353 }
  0xa2   : > { %v359_v48 = vpop.permute.xlu0 %358 }
  0xf8   : > { %v441_v28 = vpop.f32.mrb[0].mxu0  ;;  %v471_v29 = vpop.f32.mrb[0].mxu1 }
  0xf9   : > { %v442_v30 = vadd.f32 %v441_v28, %v319_v20  ;;  %v443_v31 = vpop.f32.mrb[1].mxu0  ;;  %v472_v32 = vadd.f32 %v471_v29, %v349_v26  ;;  %v473_v33 = vpop.f32.mrb[1].mxu1 }
  0xfa   : > { %v444_v34 = vadd.f32 %v443_v31, %v319_v20  ;;  %v445_v35 = vpop.f32.mrb[2].mxu0  ;;  %v474_v36 = vadd.f32 %v473_v33, %v349_v26  ;;  %v475_v37 = vpop.f32.mrb[2].mxu1 }
  0xfb   : > { %v446_v38 = vadd.f32 %v445_v35, %v324_v22  ;;  %v447_v39 = vpop.f32.mrb[3].mxu0  ;;  %v476_v40 = vadd.f32 %v475_v37, %v354_v27  ;;  %v477_v41 = vpop.f32.mrb[3].mxu1 }
  0xfc   : > { %v806_v42 = vpack.c.bf16 %v444_v34, %v442_v30  ;;  %v448_v43 = vadd.f32 %v447_v39, %v324_v22  ;;  %v812_v44 = vpack.c.bf16 %v474_v36, %v472_v32  ;;  %v478_v45 = vadd.f32 %v477_v41, %v354_v27 }
  0xfe   : > { %512 = vst [vmem:[%s1157_s16] sm:$0xff] %v806_v42  ;;  %v807_v46 = vpack.c.bf16 %v448_v43, %v446_v38  ;;  %542 = vst [vmem:[%s1160_s17 + $0x10] sm:$0xff] %v812_v44  ;;  %v813_v47 = vpack.c.bf16 %v478_v45, %v476_v40 }
 0x100   : > { %513 = vst [vmem:[%s1157_s16 + $0x8] sm:$0xff] %v807_v46  ;;  %543 = vst [vmem:[%s1160_s17 + $0x18] sm:$0xff] %v813_v47  ;;  %v451_v50 = vpop.f32.mrb[4].mxu0  ;;  %v481_v51 = vpop.f32.mrb[4].mxu1 }
 0x101   : > { %v452_v53 = vadd.f32 %v451_v50, %v329_v21  ;;  %v482_v54 = vadd.f32 %v481_v51, %v359_v48  ;;  %v453_v55 = vpop.f32.mrb[5].mxu0  ;;  %v483_v56 = vpop.f32.mrb[5].mxu1 }
 0x102   : > { %v454_v57 = vadd.f32 %v453_v55, %v329_v21  ;;  %v484_v58 = vadd.f32 %v483_v56, %v359_v48  ;;  %v455_v59 = vpop.f32.mrb[6].mxu0  ;;  %v485_v60 = vpop.f32.mrb[6].mxu1 }
 0x103   : > { %v456_v62 = vadd.f32 %v455_v59, %v334_v23  ;;  %v457_v63 = vpop.f32.mrb[7].mxu0  ;;  %v486_v0 = vpop.f32.mrb[7].mxu1 }
 0x104   : > { %v808_v1 = vpack.c.bf16 %v454_v57, %v452_v53  ;;  %v814_v2 = vpack.c.bf16 %v484_v58, %v482_v54  ;;  %v458_v3 = vadd.f32 %v457_v63, %v334_v23 }
 0x106   : > { %514 = vst [vmem:[%s1157_s16 + $0x10] sm:$0xff] %v808_v1  ;;  %v560_v4 = vsel %vm558_vm8, %v814_v2, %v559_v61  ;;  %v809_v5 = vpack.c.bf16 %v458_v3, %v456_v62 }
 0x107   : > { %561 = vst [vmem:[%s289_s27] sm:$0x77] %v560_v4 }
 0x108   : > { %515 = vst [vmem:[%s1157_s16 + $0x18] sm:$0xff] %v809_v5  ;;  %v461_v6 = vpop.f32.mrb[8].mxu0 }
 0x109   : > { %v462_v7 = vadd.f32 %v461_v6, %v1149_v24  ;;  %v463_v8 = vpop.f32.mrb[9].mxu0 }
 0x10a   : > { %903 = shalt.err (!%p900_p5)
}
 0x10b   : > { %s904_s16 = scalar_lea.hbm %s1193_s10, 512  ;;  %s908_s29 = scalar_lea.hbm %s1292_s3, 1024 }
 0x10c   : > { %p905_p6 = scmp.ne.s32.totalorder %s1193_s10, %s904_s16  ;;  %p909_p10 = scmp.lt.u32.totalorder %s1193_s10, %s1292_s3 }
 0x10d   : > { %p910_p11 = scmp.lt.u32.totalorder %s908_s29, %s904_s16  ;;  %p912_p13 = scmp.lt.u32.totalorder %s904_s16, %s1193_s10 }
 0x10e   : > { %p906_p7 = pnand %p905_p6, %p1077_p4 }
 0x10f   : > { %p911_p12 = por %p910_p11, %p909_p10 }
 0x110   : > { %p907_p9 = pneg %p906_p7 }
 0x111   : > { %p913_p0 = por %p912_p13, %p911_p12 }
 0x113   : > { %p914_p1 = pnand %p913_p0, %p907_p9 }
 0x115   : > { %917 = shalt.err (!%p914_p1)
}
 0x116   : > { %s1004_s12 = smov 128   ;;  %s1005_s15 = smov 8   ;;  %v464_v9 = vadd.f32 %v463_v8, %v1149_v24  ;;  %v465_v10 = vpop.f32.mrb[10].mxu0 }
 0x117   : > { %819 = dma.vmem_to_hbm [thread:$0]  (%p1077_p4), %s1186_s7, 512, %s1193_s10, %s563_s11, %s1004_s12, %s1004_s12, %s1005_s15   ;;  %v466_v11 = vadd.f32 %v465_v10, %v1151_v25  ;;  %v467_v12 = vpop.f32.mrb[11].mxu0 }
 0x118   : > { %s610_s24 = sshll.u32 %s1160_s17, 4  ;;  %v810_v13 = vpack.c.bf16 %v464_v9, %v462_v7  ;;  %v468_v14 = vadd.f32 %v467_v12, %v1151_v25  ;;  %s1237_s11 = scalar_lea.hbm %s1293_s4, %s815_s8  ;;  %s1229_s24 = int_to_ptr.vmem [resolvable:$true] %s610_s24 }
 0x119   : > { %s568_s16 = scalar_lea.sflag [#allocation5], %s1154_s14  ;;  %s918_s25 = scalar_lea.vmem %s1229_s24, 512 }
 0x11a   : > { %540 = vst [vmem:[%s1160_s17] sm:$0xff] %v810_v13  ;;  %v811_v15 = vpack.c.bf16 %v468_v14, %v466_v11  ;;  %p919_p2 = scmp.ne.s32.totalorder %s1229_s24, %s918_s25  ;;  %s1006_s27 = smov [#allocation4]  }
 0x11b   : > { %s922_s29 = sshll.u32 %s1006_s27, 4  ;;  %s923_s29 = int_to_ptr.vmem [resolvable:$false] %s922_s29 }
 0x11c   : > { %541 = vst [vmem:[%s1160_s17 + $0x8] sm:$0xff] %v811_v15  ;;  %p920_p3 = pnand %p919_p2, %p1077_p4  ;;  %s924_s9 = scalar_lea.vmem %s923_s29, 1024 }
 0x11d   : > { %p925_p6 = scmp.lt.s32.totalorder %s1229_s24, %s923_s29  ;;  %p926_p7 = scmp.lt.s32.totalorder %s924_s9, %s918_s25 }
 0x11e   : > { %p921_p5 = pneg %p920_p3 }
 0x11f   : > { %p927_p9 = por %p926_p7, %p925_p6 }
 0x121   : > { %p928_p10 = pnand %p927_p9, %p921_p5 }
 0x123   : > { %931 = shalt.err (!%p928_p10)
}
 0x124   : > { %s932_s21 = scalar_lea.hbm %s1237_s11, 512  ;;  %s936_s13 = scalar_lea.hbm %s1293_s4, 1024 }
 0x125   : > { %p933_p11 = scmp.ne.s32.totalorder %s1237_s11, %s932_s21  ;;  %p937_p0 = scmp.lt.u32.totalorder %s1237_s11, %s1293_s4 }
 0x126   : > { %p938_p1 = scmp.lt.u32.totalorder %s936_s13, %s932_s21  ;;  %p940_p3 = scmp.lt.u32.totalorder %s932_s21, %s1237_s11 }
 0x127   : > { %p934_p12 = pnand %p933_p11, %p1077_p4 }
 0x128   : > { %p939_p2 = por %p938_p1, %p937_p0 }
 0x129   : > { %p935_p13 = pneg %p934_p12 }
 0x12a   : > { %p941_p5 = por %p940_p3, %p939_p2 }
 0x12c   : > { %p942_p6 = pnand %p941_p5, %p935_p13 }
 0x12e   : > { %945 = shalt.err (!%p942_p6)
}
 0x12f   : > { %820 = dma.vmem_to_hbm [thread:$0]  (%p1077_p4), %s1229_s24, 512, %s1237_s11, %s568_s16, %s1004_s12, %s1004_s12, %s1005_s15  }
 0x130 PF: > { %p830_p7 = scmp.ge.s32.totalorder %s1000_s23, 2  ;;  %s629_s25 = sand.u32 1, %s980_s18  }
 0x131   : > { %s630_s27 = scalar_lea.sflag [#allocation3], %s629_s25 }
 0x132   : > { %p824_p9 = pnand %p830_p7, %p1084_p8 }
 0x134   : > { %971 = dma.done.wait (!%p824_p9), %s630_s27, 512  }
 0x135   : > { %973 = vsyncadd (!%p824_p9), %s630_s27, 4294966784  ;;  %s639_s28 = scalar_lea.sflag [#allocation5], %s629_s25 }
 0x136   : > { %975 = dma.done.wait (!%p824_p9), %s639_s28, 512  }
 0x137   : > { %977 = vsyncadd (!%p824_p9), %s639_s28, 4294966784  ;;  %s22_s23 = sadd.s32 1, %s1000_s23   ;;  %s1301_s18 = smov %s984_s19 }
 0x138   : > { %p19_p10 = scmp.ge.s32.totalorder %s22_s23, 4   ;;  %s1302_s19 = smov %s988_s20 }
 0x139   : > { %s1303_s20 = smov %s1090_s6  ;;  %s1304_s21 = smov %s996_s22 }
 0x13a   : > { %s1305_s22 = smov %s1307_s26  ;;  %21 = sbr.rel (!%p19_p10) target bundleno = 6 (0x6), region = 96 }
 0x141   :  { %656 = vsyncpa [#allocation3], 1 }
 0x142   :  { %658 = vsyncpa [#allocation3 + $0x1], 1 }
 0x143   :  { %659 = vsyncpa [#allocation5], 1 }
 0x144   :  { %661 = vsyncpa [#allocation5 + $0x1], 1 }

</bundles_post_ra>
